<compile_context>
chip_gen: v5e
topology: v5e:2x2
jax: 0.10.0
libtpu: 0.0.40
codegen_flags: <defaults>
</compile_context>

<pallas_src>
import jax
import jax.numpy as jnp
from jax.experimental import pallas as pl
from jax.experimental.pallas import tpu as pltpu

MULTIPLIER = 5.0   # module default
LIMIT = True       # module default
_CLAMP = 60.0

_LANE_CANDIDATES = (4096, 2048, 1024, 512, 256, 128)
_MIN_LANES = 128


# --------------------------------------------------------------------------- #
# Kernel
# --------------------------------------------------------------------------- #
def _gauss_kernel(x_ref, o_ref):
    x = x_ref[...]
    # Fold the final negation into the scale: y = exp(clamp(-(m*x^2), -60, 60)).
    if MULTIPLIER is None:
        t = -(x * x)
    else:
        t = (x * x) * (-MULTIPLIER)
    if LIMIT:
        if MULTIPLIER is None or MULTIPLIER >= 0:
            # t <= 0 always, so the +60 upper clamp is dead code.
            t = jnp.maximum(t, -_CLAMP)
        else:
            t = jnp.clip(t, -_CLAMP, _CLAMP)
    o_ref[...] = jnp.exp(t)


# --------------------------------------------------------------------------- #
# Wrapper helpers
# --------------------------------------------------------------------------- #
def _round_up(a, b):
    return (a + b - 1) // b * b


def _pick_block_bytes():
    """Generation-aware target block size (bytes)."""
    try:
        kind = jax.devices()[0].device_kind.lower()
    except Exception:
        return 4 * 1024 * 1024
    if "v7" in kind:
        return 6 * 1024 * 1024      # v7x: ~3.2 TB/s HBM -> bigger blocks amortize step overhead
    if "v5 lite" in kind or "v5e" in kind or "v5litepod" in kind:
        return 2 * 1024 * 1024      # v5e: ~0.82 TB/s, 2 MiB already <10% overhead
    return 4 * 1024 * 1024          # v6e and default


def _gauss_2d(x2d):
    """Run the kernel over a lane-dense (rows, lanes) slab; lanes % 128 == 0."""
    rows, lanes = x2d.shape
    itemsize = x2d.dtype.itemsize
    n = rows * lanes
    # Sublane multiple required by dtype packing (f32: 8, bf16: 16, int8: 32).
    sub = max(8, 32 // itemsize)

    block_bytes = _pick_block_bytes()
    tile_rows = max(sub, (block_bytes // (lanes * itemsize)) // sub * sub)

    # Keep >= ~4 grid steps whenever possible so double-buffering overlaps
    # read/compute/writeback and v7x can shard the grid across both TCs.
    if rows > sub:
        want = _round_up(pl.cdiv(rows, 4), sub)
        tile_rows = min(tile_rows, want)
    if tile_rows >= rows:
        tile_rows = rows  # single full-extent block (always a legal block shape)

    grid = (pl.cdiv(rows, tile_rows),)

    tile_bytes = tile_rows * lanes * itemsize
    # in + out, double-buffered, plus headroom. Max ~26 MiB (v7x 6 MiB blocks),
    # well under every generation's physical VMEM.
    vmem_limit = int(max(4 * tile_bytes + (2 << 20), 16 << 20))

    return pl.pallas_call(
        _gauss_kernel,
        out_shape=jax.ShapeDtypeStruct((rows, lanes), x2d.dtype),
        grid_spec=pltpu.PrefetchScalarGridSpec(
            num_scalar_prefetch=0,
            grid=grid,
            in_specs=[pl.BlockSpec((tile_rows, lanes), lambda i: (i, 0))],
            out_specs=pl.BlockSpec((tile_rows, lanes), lambda i: (i, 0)),
        ),
        compiler_params=pltpu.CompilerParams(
            dimension_semantics=("parallel",),
            vmem_limit_bytes=vmem_limit,
        ),
        cost_estimate=pl.CostEstimate(
            flops=3 * n,
            transcendentals=n,
            bytes_accessed=2 * n * itemsize,
        ),
    )(x2d)


def _gauss_jnp(x):
    """Plain-jnp Gauss (used for the <128-element ragged tail and as reference)."""
    t = x * x
    if MULTIPLIER is not None:
        t = MULTIPLIER * t
    if LIMIT:
        t = jnp.clip(t, -_CLAMP, _CLAMP)
    return jnp.exp(-t)


def gauss(x):
    """Elementwise Gauss activation. Works for any input shape / float dtype."""
    orig_shape = x.shape
    n = x.size
    if n == 0:
        return x

    x_flat = jnp.reshape(x, (-1,))
    rem = n % _MIN_LANES

    if rem == 0:
        # Common case: zero-copy reshape to the widest lane-dense slab.
        lanes = next(c for c in _LANE_CANDIDATES if n % c == 0)
        out = _gauss_2d(x_flat.reshape(n // lanes, lanes))
        return out.reshape(orig_shape)

    # Ragged size: kernel handles the 128-aligned prefix; the tiny (<128 elem)
    # tail is computed in plain jnp. Avoids full-tensor pad + slice HBM passes.
    n_main = n - rem
    tail_out = _gauss_jnp(x_flat[n_main:])
    if n_main == 0:
        # Entire tensor smaller than one vreg lane-row: kernel launch not worth it.
        return tail_out.reshape(orig_shape)
    lanes = next(c for c in _LANE_CANDIDATES if n_main % c == 0)
    main_out = _gauss_2d(x_flat[:n_main].reshape(n_main // lanes, lanes))
    return jnp.concatenate([main_out.reshape(-1), tail_out]).reshape(orig_shape)


# --------------------------------------------------------------------------- #
# Tests
# --------------------------------------------------------------------------- #
if __name__ == "__main__":
    # Main test: typical NN-shaped input (zero-copy, lane-dense path).
    x = jax.random.normal(jax.random.PRNGKey(0), (2, 4, 16, 16), dtype=jnp.float32)
    y = gauss(x)
    jax.block_until_ready(y)
    assert y.shape == x.shape and y.dtype == x.dtype
    assert jnp.allclose(y, _gauss_jnp(x), atol=1e-6, rtol=1e-6)

    # Multi-block path (several grid steps, exercises pipelining clamp).
    x1 = jax.random.normal(jax.random.PRNGKey(2), (16, 4, 32, 32), dtype=jnp.float32)
    y1 = gauss(x1)
    jax.block_until_ready(y1)
    assert jnp.allclose(y1, _gauss_jnp(x1), atol=1e-6, rtol=1e-6)

    # Ragged size >= 128: kernel prefix + plain-jnp tail.
    x2 = jax.random.normal(jax.random.PRNGKey(1), (3, 5, 17), dtype=jnp.float32)
    y2 = gauss(x2)
    jax.block_until_ready(y2)
    assert y2.shape == x2.shape and y2.dtype == x2.dtype
    assert jnp.allclose(y2, _gauss_jnp(x2), atol=1e-6, rtol=1e-6)

    # Tiny ragged size < 128: pure-jnp path.
    x3 = jax.random.normal(jax.random.PRNGKey(3), (3, 5, 7), dtype=jnp.float32)
    y3 = gauss(x3)
    jax.block_until_ready(y3)
    assert y3.shape == x3.shape and y3.dtype == x3.dtype
    assert jnp.allclose(y3, _gauss_jnp(x3), atol=1e-6, rtol=1e-6)

    print("KERNEL_OK")
</pallas_src>

<mosaic_0001>
module attributes {stable_mosaic.version = 11 : i64} {
  func.func @_gauss_kernel(%arg0: i32, %arg1: memref<1x2048xf32, #tpu.memory_space<vmem>>, %arg2: memref<1x2048xf32, #tpu.memory_space<vmem>>) attributes {dimension_semantics = [#tpu.dimension_semantics<parallel>], iteration_bounds = array<i64: 1>, scalar_prefetch = 0 : i64, scratch_operands = 0 : i64, tpu.core_type = #tpu.core_type<tc>, window_params = [{transform_indices = @transform_0, window_bounds = array<i64: 1, 2048>}, {transform_indices = @transform_1, window_bounds = array<i64: 1, 2048>}]} {
    %c0 = arith.constant 0 : index
    %c0_0 = arith.constant 0 : index
    %0 = vector.load %arg1[%c0, %c0_0] : memref<1x2048xf32, #tpu.memory_space<vmem>>, vector<1x2048xf32>
    %1 = arith.mulf %0, %0 : vector<1x2048xf32>
    %cst = arith.constant -5.000000e+00 : f32
    %2 = vector.broadcast %cst : f32 to vector<1x2048xf32>
    %3 = arith.mulf %1, %2 : vector<1x2048xf32>
    %cst_1 = arith.constant -6.000000e+01 : f32
    %4 = vector.broadcast %cst_1 : f32 to vector<1x2048xf32>
    %5 = arith.maximumf %3, %4 : vector<1x2048xf32>
    %6 = math.exp %5 : vector<1x2048xf32>
    %c0_2 = arith.constant 0 : index
    %c0_3 = arith.constant 0 : index
    %7 = vector.load %arg2[%c0_2, %c0_3] : memref<1x2048xf32, #tpu.memory_space<vmem>>, vector<1x2048xf32>
    tpu.vector_store %arg2[%c0_2, %c0_3], %6 {strides = array<i32>} : memref<1x2048xf32, #tpu.memory_space<vmem>>, vector<1x2048xf32>,
    return
  }
  func.func @transform_0(%arg0: i32) -> (i32, i32) {
    %c0_i32 = arith.constant 0 : i32
    %c0_i32_0 = arith.constant 0 : i32
    return %arg0, %c0_i32 : i32, i32
  }
  func.func @transform_1(%arg0: i32) -> (i32, i32) {
    %c0_i32 = arith.constant 0 : i32
    %c0_i32_0 = arith.constant 0 : i32
    return %arg0, %c0_i32 : i32, i32
  }
}

</mosaic_0001>

<bundles_post_ra>
// kernel: tpu_custom_call.1
= control target key start
LH: loop header
LB: loop body
LE: loop exit
PB: predicated region body
PF: predicated region fallthrough
CT: control target
= control target key end

     0   :  { %6 = vsyncpa [#allocation3], 0  ;;  %s130_s0 = inlined_call_operand.hbm [shape: f32[1,2048], index: 0, kind: input, shape index: {}]   ;;  %s131_s1 = inlined_call_operand.hbm [shape: f32[1,2048], index: 1, kind: output, shape index: {}]  }
   0x1   :  { %7 = vsyncpa [#allocation4], 0  ;;  %s13_s8 = sshll.u32 %s130_s0, 4  ;;  %s112_s9 = smov [#allocation2]   ;;  %s14_s8 = int_to_ptr.hbm [resolvable:$true] %s13_s8 }
   0x2   :  { %s15_s10 = sshll.u32 %s112_s9, 4  ;;  %s16_s10 = int_to_ptr.vmem [resolvable:$true] %s15_s10 }
   0x3   :  { %18 = dma.hbm_to_vmem [thread:$0]  %s14_s8, 256, %s16_s10, [#allocation3]  }
   0x4   :  { %108 = dma.done.wait [#allocation3], 256  }
   0x5   :  { %109 = vsyncadd [#allocation3], 4294967040  ;;  %v23_v0 = vld [vmem:[#allocation2] sm:$0xff]  ;;  %v24_v1 = vld [vmem:[#allocation2 + $0x8] sm:$0xff]  ;;  %s113_s0 = smov [#allocation5]   ;;  %s44_s14 = sshll.u32 %s131_s1, 4  ;;  %s45_s14 = int_to_ptr.hbm [resolvable:$true] %s44_s14 }
   0x6   :  { %v25_v2 = vmul.f32 %v23_v0, %v23_v0  ;;  %v26_v3 = vmul.f32 %v24_v1, %v24_v1  ;;  %s42_s11 = sshll.u32 %s113_s0, 4  ;;  %s43_s11 = int_to_ptr.vmem [resolvable:$true] %s42_s11 }
   0x8   :  { %v27_v4 = vmul.f32 -5.0, %v25_v2  ;;  %v28_v5 = vmul.f32 -5.0, %v26_v3 }
   0xa   :  { %v29_v6 = vmax.f32 %v27_v4, -60.0  ;;  %v30_v7 = vmax.f32 %v28_v5, -60.0 }
   0xc   :  { %v31_v8 = vmul.f32 1.442695, %v29_v6  ;;  %v33_v9 = vmul.f32 1.442695, %v30_v7 }
   0xe   :  { %56 = vpow2.f32 %v31_v8 }
   0xf   :  { %58 = vpow2.f32 %v33_v9 }
  0x14   :  { %v57_v10 = vpop.eup %56 }
  0x15   :  { %v59_v11 = vpop.eup %58  ;;  %35 = vst [vmem:[#allocation5] sm:$0xff] %v57_v10 }
  0x16   :  { %36 = vst [vmem:[#allocation5 + $0x8] sm:$0xff] %v59_v11 }
  0x17   :  { %47 = dma.vmem_to_hbm [thread:$0]  %s43_s11, 256, %s45_s14, [#allocation4]  }
  0x18   :  { %110 = dma.done.wait [#allocation4], 256  }
  0x19   :  { %111 = vsyncadd [#allocation4], 4294967040 }
  0x1a   :  { %52 = vsyncpa [#allocation3], 1 }
  0x1b   :  { %53 = vsyncpa [#allocation4], 1 }

</bundles_post_ra>
